<compile_context>
chip_gen: v7x
topology: tpu7x:2x2x1
jax: 0.10.0
libtpu: 0.0.40
codegen_flags: <defaults>
</compile_context>

<pallas_src>
import functools

import jax
import jax.numpy as jnp
from jax.experimental import pallas as pl
from jax.experimental.pallas import tpu as pltpu


# ---------------------------------------------------------------------------
# Phase 1: projection MLP + row normalization (computed once per row tile)
# ---------------------------------------------------------------------------
def projection_kernel(x_ref, w1_ref, b1_ref, w2_ref, b2_ref, zn_ref):
    x = x_ref[...].astype(jnp.float32)                                  # (tm, in_dim)
    h = jnp.dot(x, w1_ref[...], preferred_element_type=jnp.float32) + b1_ref[...]
    h = jnp.maximum(h, 0.0)
    z = jnp.dot(h, w2_ref[...], preferred_element_type=jnp.float32) + b2_ref[...]  # (tm, Z)

    # F.normalize(dim=1, eps=1e-12): z / max(||z||, 1e-12) == z * rsqrt(max(sumsq, 1e-24))
    sumsq = jnp.sum(z * z, axis=1, keepdims=True)
    zn = z * jax.lax.rsqrt(jnp.maximum(sumsq, 1e-24))
    zn_ref[...] = zn.astype(zn_ref.dtype)


# ---------------------------------------------------------------------------
# Phase 2: tiled NT-Xent with online logsumexp over column tiles
# ---------------------------------------------------------------------------
def ntxent_kernel(zr_ref, zc_ref, zp_ref, out_ref, m_scr, l_scr, *,
                  inv_temp, tm, tn):
    i = pl.program_id(0)           # row tile
    j = pl.program_id(1)           # col tile (reduction axis, "arbitrary", last)
    nc = pl.num_programs(1)

    @pl.when(j == 0)
    def _init():
        # large finite negative (not -inf) so exp(m_old - m_new) never NaNs
        m_scr[...] = jnp.full_like(m_scr, -1e30)
        l_scr[...] = jnp.zeros_like(l_scr)

    # (tm, tn) tile of the cosine-similarity matrix (rows already unit-norm)
    s = jax.lax.dot_general(
        zr_ref[...], zc_ref[...], (((1,), (1,)), ((), ())),
        preferred_element_type=jnp.float32)
    logits = s * inv_temp

    # diagonal (self-similarity) mask from tile-local iotas only
    row_ids = i * tm + jax.lax.broadcasted_iota(jnp.int32, (tm, tn), 0)
    col_ids = j * tn + jax.lax.broadcasted_iota(jnp.int32, (tm, tn), 1)
    logits = jnp.where(row_ids == col_ids, -1e30, logits)

    # online logsumexp update
    m_prev = m_scr[...]
    m_new = jnp.maximum(m_prev, jnp.max(logits, axis=1, keepdims=True))
    l_scr[...] = (l_scr[...] * jnp.exp(m_prev - m_new)
                  + jnp.sum(jnp.exp(logits - m_new), axis=1, keepdims=True))
    m_scr[...] = m_new

    @pl.when(j == nc - 1)
    def _finalize():
        lse = m_scr[...] + jnp.log(l_scr[...])                          # (tm, 1)
        # positives: row-wise dot of zn[i] with its partner zn[(i+N) mod 2N]
        pos = jnp.sum(zr_ref[...].astype(jnp.float32)
                      * zp_ref[...].astype(jnp.float32),
                      axis=1, keepdims=True)                            # (tm, 1)
        per_row = lse - pos * inv_temp                                  # (tm, 1)
        # lane-dense (width-128) store; column 0 is read back outside
        out_ref[...] = jnp.broadcast_to(per_row, out_ref.shape).astype(out_ref.dtype)


def _pick_tile(dim, cap=128):
    for t in (cap, 128, 64, 32, 16, 8):
        if t <= cap and dim % t == 0:
            return t
    return dim


def simclr_forward(z12, w1, b1, w2, b2, temperature=0.5, *,
                   sim_dtype=jnp.float32):
    """Fused SimCLR forward: projection MLP -> normalize -> NT-Xent loss (scalar)."""
    two_n, in_dim = z12.shape
    n = two_n // 2
    out_dim = w2.shape[1]

    # row tile must divide N so the partner-tile index_map is exact;
    # col tile must divide 2N. 128 matches v5e MXU; v6e/v7x accept 128-multiples.
    tm = _pick_tile(n)
    tn = _pick_tile(two_n)
    assert n % tm == 0 and two_n % tn == 0 and tm % 8 == 0 and tn % 8 == 0, (
        "batch must be padded so that N is a multiple of 8")  # TODO(synk): pad tiny batches

    r = two_n // tm          # number of row tiles
    c = two_n // tn          # number of col tiles
    r_half = n // tm         # row-tile shift of the positive partner

    # ---- Phase 1: zn = normalize(MLP(z12)), computed once ----
    zn = pl.pallas_call(
        projection_kernel,
        out_shape=jax.ShapeDtypeStruct((two_n, out_dim), sim_dtype),
        grid_spec=pltpu.PrefetchScalarGridSpec(
            num_scalar_prefetch=0,
            grid=(two_n // tm,),
            in_specs=[
                pl.BlockSpec((tm, in_dim), lambda i: (i, 0)),
                # constant block index -> weights stay VMEM-resident across tiles
                pl.BlockSpec(w1.shape, lambda i: (0, 0)),
                pl.BlockSpec(b1.shape, lambda i: (0, 0)),
                pl.BlockSpec(w2.shape, lambda i: (0, 0)),
                pl.BlockSpec(b2.shape, lambda i: (0, 0)),
            ],
            out_specs=pl.BlockSpec((tm, out_dim), lambda i: (i, 0)),
        ),
        compiler_params=pltpu.CompilerParams(
            dimension_semantics=("parallel",)),
    )(z12, w1, b1, w2, b2)

    # ---- Phase 2: tiled online-logsumexp NT-Xent over zn ----
    kernel = functools.partial(
        ntxent_kernel, inv_temp=1.0 / temperature, tm=tm, tn=tn)
    per_row = pl.pallas_call(
        kernel,
        out_shape=jax.ShapeDtypeStruct((two_n, 128), jnp.float32),
        grid_spec=pltpu.PrefetchScalarGridSpec(
            num_scalar_prefetch=0,
            grid=(r, c),
            in_specs=[
                pl.BlockSpec((tm, out_dim), lambda i, j: (i, 0)),                    # rows
                pl.BlockSpec((tn, out_dim), lambda i, j: (j, 0)),                    # cols
                pl.BlockSpec((tm, out_dim), lambda i, j: ((i + r_half) % r, 0)),     # partners
            ],
            out_specs=pl.BlockSpec((tm, 128), lambda i, j: (i, 0)),
            scratch_shapes=[pltpu.VMEM((tm, 1), jnp.float32),   # running max
                            pltpu.VMEM((tm, 1), jnp.float32)],  # running sum
        ),
        compiler_params=pltpu.CompilerParams(
            dimension_semantics=("parallel", "arbitrary")),
    )(zn, zn, zn)

    # final scalar reduction (tiny) in plain JAX
    return jnp.sum(per_row[:, 0]) / two_n


def simclr_reference(z12, w1, b1, w2, b2, temperature=0.5):
    # pure-JAX reference mirroring the PyTorch semantics
    h = jnp.maximum(z12 @ w1 + b1, 0.0)
    z = h @ w2 + b2
    zn = z / jnp.maximum(jnp.linalg.norm(z, axis=1, keepdims=True), 1e-12)
    sim = zn @ zn.T
    two_n = sim.shape[0]
    n = two_n // 2
    idx = jnp.arange(two_n)
    pos = sim[idx, (idx + n) % two_n]
    logits = jnp.where(jnp.eye(two_n, dtype=bool), -jnp.inf, sim / temperature)
    lse = jax.scipy.special.logsumexp(logits, axis=1)
    return jnp.sum(lse - pos / temperature) / two_n


if __name__ == "__main__":
    # MXU-aligned small shapes: 2N = 256 rows -> 2x2 grid of 128x128 sim tiles
    N = 128
    in_dim, hidden_dim, out_dim = 128, 256, 128
    temperature = 0.5

    key = jax.random.PRNGKey(0)
    k_x, k_w1, k_b1, k_w2, k_b2 = jax.random.split(key, 5)

    z12 = jax.random.normal(k_x, (2 * N, in_dim), dtype=jnp.float32)

    # deterministic parameter init (PyTorch-Linear-like uniform fan-in scaling)
    lim1 = 1.0 / jnp.sqrt(in_dim)
    lim2 = 1.0 / jnp.sqrt(hidden_dim)
    w1 = jax.random.uniform(k_w1, (in_dim, hidden_dim), jnp.float32, -lim1, lim1)
    b1 = jax.random.uniform(k_b1, (1, hidden_dim), jnp.float32, -lim1, lim1)
    w2 = jax.random.uniform(k_w2, (hidden_dim, out_dim), jnp.float32, -lim2, lim2)
    b2 = jax.random.uniform(k_b2, (1, out_dim), jnp.float32, -lim2, lim2)

    loss = simclr_forward(z12, w1, b1, w2, b2, temperature=temperature)
    loss = jax.block_until_ready(loss)

    ref = simclr_reference(z12, w1, b1, w2, b2, temperature=temperature)
    assert jnp.allclose(loss, ref, atol=1e-4, rtol=1e-4), (loss, ref)

    print("KERNEL_OK")
</pallas_src>

<mosaic_0001>
module attributes {stable_mosaic.version = 11 : i64} {
  func.func @projection_kernel(%arg0: i32, %arg1: memref<128x128xf32, #tpu.memory_space<vmem>>, %arg2: memref<128x256xf32, #tpu.memory_space<vmem>>, %arg3: memref<1x256xf32, #tpu.memory_space<vmem>>, %arg4: memref<256x128xf32, #tpu.memory_space<vmem>>, %arg5: memref<1x128xf32, #tpu.memory_space<vmem>>, %arg6: memref<128x128xf32, #tpu.memory_space<vmem>>) attributes {dimension_semantics = [#tpu.dimension_semantics<parallel>], iteration_bounds = array<i64: 2>, scalar_prefetch = 0 : i64, scratch_operands = 0 : i64, tpu.core_type = #tpu.core_type<tc>, window_params = [{transform_indices = @transform_0, window_bounds = array<i64: 128, 128>}, {pipeline_mode = #tpu.pipeline_mode<synchronous>, transform_indices = @transform_1, window_bounds = array<i64: 128, 256>}, {pipeline_mode = #tpu.pipeline_mode<synchronous>, transform_indices = @transform_2, window_bounds = array<i64: 1, 256>}, {pipeline_mode = #tpu.pipeline_mode<synchronous>, transform_indices = @transform_3, window_bounds = array<i64: 256, 128>}, {pipeline_mode = #tpu.pipeline_mode<synchronous>, transform_indices = @transform_4, window_bounds = array<i64: 1, 128>}, {transform_indices = @transform_5, window_bounds = array<i64: 128, 128>}]} {
    %c0 = arith.constant 0 : index
    %c0_0 = arith.constant 0 : index
    %0 = vector.load %arg1[%c0, %c0_0] : memref<128x128xf32, #tpu.memory_space<vmem>>, vector<128x128xf32>
    %c0_1 = arith.constant 0 : index
    %c0_2 = arith.constant 0 : index
    %1 = vector.load %arg2[%c0_1, %c0_2] : memref<128x256xf32, #tpu.memory_space<vmem>>, vector<128x256xf32>
    %cst = arith.constant dense<0.000000e+00> : vector<128x256xf32>
    %2 = tpu.matmul %0, %1, %cst {dimension_numbers = #tpu.dot_dimension_numbers<[1], [0], [0], [1], [0, 0, 1, 1], [], []>} : vector<128x128xf32>, vector<128x256xf32>, vector<128x256xf32> -> vector<128x256xf32>
    %c0_3 = arith.constant 0 : index
    %c0_4 = arith.constant 0 : index
    %3 = vector.load %arg3[%c0_3, %c0_4] : memref<1x256xf32, #tpu.memory_space<vmem>>, vector<1x256xf32>
    %4 = vector.broadcast %3 : vector<1x256xf32> to vector<128x256xf32>
    %5 = arith.addf %2, %4 : vector<128x256xf32>
    %cst_5 = arith.constant 0.000000e+00 : f32
    %6 = vector.broadcast %cst_5 : f32 to vector<128x256xf32>
    %7 = arith.maximumf %5, %6 : vector<128x256xf32>
    %c0_6 = arith.constant 0 : index
    %c0_7 = arith.constant 0 : index
    %8 = vector.load %arg4[%c0_6, %c0_7] : memref<256x128xf32, #tpu.memory_space<vmem>>, vector<256x128xf32>
    %cst_8 = arith.constant dense<0.000000e+00> : vector<128x128xf32>
    %9 = tpu.matmul %7, %8, %cst_8 {dimension_numbers = #tpu.dot_dimension_numbers<[1], [0], [0], [1], [0, 0, 1, 1], [], []>} : vector<128x256xf32>, vector<256x128xf32>, vector<128x128xf32> -> vector<128x128xf32>
    %c0_9 = arith.constant 0 : index
    %c0_10 = arith.constant 0 : index
    %10 = vector.load %arg5[%c0_9, %c0_10] : memref<1x128xf32, #tpu.memory_space<vmem>>, vector<1x128xf32>
    %11 = vector.broadcast %10 : vector<1x128xf32> to vector<128x128xf32>
    %12 = arith.addf %9, %11 : vector<128x128xf32>
    %13 = arith.mulf %12, %12 : vector<128x128xf32>
    %cst_11 = arith.constant dense<0.000000e+00> : vector<128xf32>
    %14 = vector.multi_reduction <add>, %13, %cst_11 [1] : vector<128x128xf32> to vector<128xf32>
    %15 = vector.shape_cast %14 : vector<128xf32> to vector<128x1xf32>
    %cst_12 = arith.constant 1.000000e-24 : f32
    %16 = vector.broadcast %cst_12 : f32 to vector<128x1xf32>
    %17 = arith.maximumf %15, %16 : vector<128x1xf32>
    %18 = math.rsqrt %17 : vector<128x1xf32>
    %19 = vector.broadcast %18 : vector<128x1xf32> to vector<128x128xf32>
    %20 = arith.mulf %12, %19 : vector<128x128xf32>
    %c0_13 = arith.constant 0 : index
    %c0_14 = arith.constant 0 : index
    %21 = vector.load %arg6[%c0_13, %c0_14] : memref<128x128xf32, #tpu.memory_space<vmem>>, vector<128x128xf32>
    tpu.vector_store %arg6[%c0_13, %c0_14], %20 {strides = array<i32>} : memref<128x128xf32, #tpu.memory_space<vmem>>, vector<128x128xf32>,
    return
  }
  func.func @transform_0(%arg0: i32) -> (i32, i32) {
    %c0_i32 = arith.constant 0 : i32
    %c0_i32_0 = arith.constant 0 : i32
    return %arg0, %c0_i32 : i32, i32
  }
  func.func @transform_1(%arg0: i32) -> (i32, i32) {
    %c0_i32 = arith.constant 0 : i32
    %c0_i32_0 = arith.constant 0 : i32
    %c0_i32_1 = arith.constant 0 : i32
    return %c0_i32, %c0_i32_0 : i32, i32
  }
  func.func @transform_2(%arg0: i32) -> (i32, i32) {
    %c0_i32 = arith.constant 0 : i32
    %c0_i32_0 = arith.constant 0 : i32
    %c0_i32_1 = arith.constant 0 : i32
    return %c0_i32, %c0_i32_0 : i32, i32
  }
  func.func @transform_3(%arg0: i32) -> (i32, i32) {
    %c0_i32 = arith.constant 0 : i32
    %c0_i32_0 = arith.constant 0 : i32
    %c0_i32_1 = arith.constant 0 : i32
    return %c0_i32, %c0_i32_0 : i32, i32
  }
  func.func @transform_4(%arg0: i32) -> (i32, i32) {
    %c0_i32 = arith.constant 0 : i32
    %c0_i32_0 = arith.constant 0 : i32
    %c0_i32_1 = arith.constant 0 : i32
    return %c0_i32, %c0_i32_0 : i32, i32
  }
  func.func @transform_5(%arg0: i32) -> (i32, i32) {
    %c0_i32 = arith.constant 0 : i32
    %c0_i32_0 = arith.constant 0 : i32
    return %arg0, %c0_i32 : i32, i32
  }
}

</mosaic_0001>

<bundles_post_ra>
// kernel: tpu_custom_call.1
= control target key start
LH: loop header
LB: loop body
LE: loop exit
PB: predicated region body
PF: predicated region fallthrough
CT: control target
= control target key end

     0   :  { %10 = vsyncpa [#allocation3], 0  ;;  %s1836_s0 = inlined_call_operand.hbm [shape: f32[256,128], index: 0, kind: input, shape index: {}]   ;;  %s1837_s1 = inlined_call_operand.hbm [shape: f32[128,256], index: 1, kind: input, shape index: {}]   ;;  %s1838_s2 = inlined_call_operand.vmem [shape: f32[1,256], index: 2, kind: input, shape index: {}]   ;;  %s1839_s3 = inlined_call_operand.hbm [shape: f32[256,128], index: 3, kind: input, shape index: {}]   ;;  %s1840_s4 = inlined_call_operand.vmem [shape: f32[1,128], index: 4, kind: input, shape index: {}]   ;;  %s1841_s5 = inlined_call_operand.hbm [shape: f32[256,128], index: 5, kind: output, shape index: {}]  }
   0x1   :  { %12 = vsyncpa [#allocation3 + $0x1], 0 }
   0x2   :  { %13 = vsyncpa [#allocation6], 0 }
   0x3   :  { %14 = vsyncpa [#allocation4], 0 }
   0x4   :  { %16 = vsyncpa [#allocation4 + $0x1], 0  ;;  %s1399_s18 = smov 0   ;;  %s1401_s19 = smov 0  }
   0x5   :  { %s1403_s20 = smov 0   ;;  %s1405_s21 = smov 0  }
   0x6 LB: > { %s1420_s22 = sadd.s32 4294967295, %s1356_s21   ;;  %s929_s23 = sadd.s32 4294967294, %s1356_s21   ;;  %s1356_s21 = sphi %s1405_s21, %s1861_s21   ;;  %s1352_s20 = sphi %s1403_s20, %s1860_s20   ;;  %s1348_s19 = sphi %s1401_s19, %s1859_s19   ;;  %s1344_s18 = sphi %s1399_s18, %s1858_s18  }
   0x7   : > { %p42_p0 = scmp.ne.s32.totalorder %s1348_s19, %s1344_s18  ;;  %p1842_p1 = scmp.eq.s32.totalorder %s1420_s22, 0 }
   0x8   : > { %p156_p3 = scmp.eq.s32.totalorder %s929_s23, 1  ;;  %p930_p5 = scmp.ge.s32.totalorder %s1356_s21, 1 }
   0x9   : > { %p1429_p4 = por %p1842_p1, %p42_p0  ;;  %p163_p7 = scmp.lt.s32.totalorder %s1356_s21, 3 }
   0xa   : > { %p1434_p6 = por %p156_p3, %p42_p0  ;;  %s1358_s27 = smov [#allocation5]  }
   0xb   : > { %s1845_s24 = scalar_select %p1429_p4, 1, 0 }
   0xc   : > { %s1846_s25 = scalar_select %p1434_p6, 1, 0 }
   0xd   : > { %p1439_p8 = pnand %p930_p5, %p163_p7  ;;  %s175_s28 = sshll.u32 %s1358_s27, 4  ;;  %s1443_s28 = int_to_ptr.vmem [resolvable:$true] %s175_s28 }
   0xe   : > { %s1359_s30 = smov [#allocation7]   ;;  %s1200_s9 = scalar_lea.hbm %s1837_s1, 4096 }
   0xf   : > { %p1106_p9 = pneg %p1439_p8  ;;  %s191_s6 = sshll.u32 %s1359_s30, 4  ;;  %s1454_s6 = int_to_ptr.vmem [resolvable:$true] %s191_s6 }
  0x10   : > { %p1201_p12 = scmp.ne.s32.totalorder %s1837_s1, %s1200_s9  ;;  %p1207_p5 = scmp.lt.u32.totalorder %s1200_s9, %s1837_s1 }
  0x11   : > { %p1450_p11 = pnand %p1106_p9, %p1842_p1 }
  0x13   : > { %p1202_p13 = pneg %p1450_p11 }
  0x15   : > { %p1203_p0 = pnand %p1202_p13, %p1201_p12 }
  0x17   : > { %p1204_p3 = pneg %p1203_p0 }
  0x19   : > { %p1209_p7 = pnand %p1207_p5, %p1204_p3 }
  0x1b   : > { %1212 = shalt.err (!%p1209_p7)
}
  0x1c   : > { %s1213_s14 = scalar_lea.vmem %s1443_s28, 4096  ;;  %p1221_p2 = scmp.lt.s32.totalorder %s1443_s28, %s1443_s28 }
  0x1d   : > { %p1214_p9 = scmp.ne.s32.totalorder %s1443_s28, %s1213_s14  ;;  %p1222_p12 = scmp.lt.s32.totalorder %s1213_s14, %s1213_s14 }
  0x1f   : > { %p1216_p10 = pnand %p1214_p9, %p1202_p13  ;;  %p1223_p0 = por %p1222_p12, %p1221_p2 }
  0x21   : > { %p1217_p1 = pneg %p1216_p10 }
  0x23   : > { %p1224_p6 = pnand %p1223_p0, %p1217_p1 }
  0x25   : > { %1227 = shalt.err (!%p1224_p6)
}
  0x26   : > { %s1360_s15 = smov 256   ;;  %s1361_s16 = smov 16  }
  0x27   : > { %1109 = dma.hbm_to_vmem [thread:$0]  (!%p1450_p11), %s1837_s1, 4096, %s1443_s28, [#allocation6], %s1360_s15, %s1360_s15, %s1361_s16  }
  0x28   : > { %s1228_s7 = scalar_lea.hbm %s1839_s3, 4096 }
  0x29   : > { %p1229_p2 = scmp.ne.s32.totalorder %s1839_s3, %s1228_s7  ;;  %p1235_p10 = scmp.lt.u32.totalorder %s1228_s7, %s1839_s3 }
  0x2b   : > { %p1231_p1 = pnand %p1229_p2, %p1202_p13 }
  0x2d   : > { %p1232_p6 = pneg %p1231_p1 }
  0x2f   : > { %p1237_p3 = pnand %p1235_p10, %p1232_p6 }
  0x31   : > { %1240 = shalt.err (!%p1237_p3)
}
  0x32   : > { %s1241_s28 = scalar_lea.vmem %s1454_s6, 4096  ;;  %p1249_p12 = scmp.lt.s32.totalorder %s1454_s6, %s1454_s6 }
  0x33   : > { %p1242_p5 = scmp.ne.s32.totalorder %s1454_s6, %s1241_s28  ;;  %p1250_p0 = scmp.lt.s32.totalorder %s1241_s28, %s1241_s28 }
  0x35   : > { %p1244_p7 = pnand %p1242_p5, %p1202_p13  ;;  %p1251_p2 = por %p1250_p0, %p1249_p12 }
  0x37   : > { %p1245_p9 = pneg %p1244_p7 }
  0x39   : > { %p1252_p1 = pnand %p1251_p2, %p1245_p9 }
  0x3b   : > { %1255 = shalt.err (!%p1252_p1)
}
  0x3c   : > { %s1362_s12 = smov 128   ;;  %s1363_s13 = smov 8  }
  0x3d   : > { %1112 = dma.hbm_to_vmem [thread:$0]  (!%p1450_p11), %s1839_s3, 4096, %s1454_s6, [#allocation6], %s1362_s12, %s1362_s12, %s1363_s13  }
  0x3e   : > { %s1512_s16 = sadd.s32 1, %s1356_s21   ;;  %s29_s23 = sadd.s32 1, %s1352_s20 }
  0x3f   : > { %s26_s17 = ssub.s32 %s1356_s21, %s1512_s16  ;;  %p36_p6 = scmp.ne.s32.totalorder %s1352_s20, %s1348_s19 }
  0x40   : > { %p27_p13 = scmp.eq.s32.totalorder %s26_s17, 0  ;;  %p37_p10 = scmp.eq.s32.totalorder %s1356_s21, 0 }
  0x41   : > { %p1849_p5 = scmp.eq.s32.totalorder %s1420_s22, 1  ;;  %p1123_p9 = scmp.lt.s32.totalorder %s1356_s21, 2 }
  0x42   : > { %s1521_s27 = scalar_select %p27_p13, %s1352_s20, %s29_s23  }
  0x43   : > { %p38_p3 = por %p37_p10, %p36_p6  ;;  %p1525_p7 = por %p1849_p5, %p36_p6 }
  0x44   : > { %s208_s30 = sand.u32 1, %s1352_s20   ;;  %s948_s6 = sshll.u32 %s1356_s21, 11 }
  0x45   : > { %s1850_s29 = scalar_select %p1525_p7, 1, 0 }
  0x46   : > { %s934_s7 = sshll.u32 %s208_s30, 7  ;;  %s1535_s10 = scalar_lea.hbm %s1836_s0, %s948_s6 }
  0x47   : > { %s212_s11 = scalar_lea.vmem [#allocation2], %s934_s7  ;;  %p1539_p11 = pnand %p1123_p9, %p38_p3 }
  0x48   : > { %s219_s28 = sshll.u32 %s212_s11, 4  ;;  %s1543_s15 = scalar_lea.sflag [#allocation3], %s208_s30  ;;  %s1537_s28 = int_to_ptr.vmem [resolvable:$true] %s219_s28 }
  0x49   : > { %s1256_s17 = scalar_lea.hbm %s1535_s10, 2048  ;;  %p1258_p0 = pneg %p1539_p11 }
  0x4a   : > { %p1257_p12 = scmp.ne.s32.totalorder %s1535_s10, %s1256_s17  ;;  %s1261_s6 = scalar_lea.hbm %s1836_s0, 4096 }
  0x4b   : > { %p1262_p13 = scmp.lt.u32.totalorder %s1535_s10, %s1836_s0  ;;  %p1263_p6 = scmp.lt.u32.totalorder %s1261_s6, %s1256_s17 }
  0x4c   : > { %p1259_p2 = pnand %p1258_p0, %p1257_p12  ;;  %p1265_p3 = scmp.lt.u32.totalorder %s1256_s17, %s1535_s10 }
  0x4d   : > { %p1264_p10 = por %p1263_p6, %p1262_p13 }
  0x4e   : > { %p1260_p1 = pneg %p1259_p2 }
  0x4f   : > { %p1266_p5 = por %p1265_p3, %p1264_p10 }
  0x51   : > { %p1267_p9 = pnand %p1266_p5, %p1260_p1 }
  0x53   : > { %1270 = shalt.err (!%p1267_p9)
}
  0x54   : > { %s1271_s30 = scalar_lea.vmem %s1537_s28, 2048  ;;  %s1364_s11 = smov [#allocation2]  }
  0x55   : > { %p1272_p12 = scmp.ne.s32.totalorder %s1537_s28, %s1271_s30  ;;  %s1276_s23 = sshll.u32 %s1364_s11, 4  ;;  %s1277_s23 = int_to_ptr.vmem [resolvable:$false] %s1276_s23 }
  0x56   : > { %s1278_s7 = scalar_lea.vmem %s1277_s23, 4096  ;;  %p1279_p4 = scmp.lt.s32.totalorder %s1537_s28, %s1277_s23 }
  0x57   : > { %p1274_p2 = pnand %p1272_p12, %p1258_p0  ;;  %p1280_p13 = scmp.lt.s32.totalorder %s1278_s7, %s1271_s30 }
  0x59   : > { %p1275_p7 = pneg %p1274_p2  ;;  %p1281_p6 = por %p1280_p13, %p1279_p4 }
  0x5b   : > { %p1282_p10 = pnand %p1281_p6, %p1275_p7 }
  0x5d   : > { %1285 = shalt.err (!%p1282_p10)
}
  0x5e   : > { %1116 = dma.hbm_to_vmem [thread:$0]  (!%p1539_p11), %s1535_s10, 2048, %s1537_s28, %s1543_s15, %s1362_s12, %s1362_s12, %s1363_s13  }
  0x5f   : > { %231 = sbr.rel (%p1439_p8) target bundleno = 810 (0x32a), region = 40  ;;  %s1577_s17 = sand.u32 (!%p1439_p8), 1, %s1348_s19  }
  0x60   : > { %s938_s6 = sshll.u32 (!%p1439_p8), %s1577_s17, 7  ;;  %s234_s8 = scalar_lea.sflag (!%p1439_p8), [#allocation3], %s1577_s17 }
  0x61   : > { %s1583_s14 = scalar_lea.vmem (!%p1439_p8), [#allocation2], %s938_s6  ;;  %p1852_p4 = scmp.ne.s32.totalorder (!%p1439_p8), %s1845_s24, 0 }
  0x66   : > { %1331 = dma.done.wait (%p1852_p4), %s234_s8, 2048  }
  0x67   : > { %1333 = vsyncadd (%p1852_p4), %s234_s8, 4294965248  ;;  %p1853_p7 = scmp.eq.s32.totalorder %s1420_s22, 0 }
  0x69   : > { %1335 = dma.done.wait (%p1853_p7), [#allocation6], 8192   ;;  %p1854_p8 = pmov %p1853_p7 }
  0x6a   : > { %v1365_v0 = vmov 0.0   ;;  %v291_v1 = vld [vmem:[#allocation5 + $0x8] sm:$0xff]  ;;  %v293_v2 = vld [vmem:[#allocation5 + $0x18] sm:$0xff]  ;;  %v290_v3 = vld [vmem:[#allocation5] sm:$0xff]  ;;  %s1752_s10 = scalar_lea.vmem [#allocation8], %s938_s6  ;;  %s949_s28 = sshll.u32 %s1420_s22, 11 }
  0x6b   : > { %1337 = vsyncadd (%p1854_p8), [#allocation6], 4294959104  ;;  %398 = vmatprep.mubr.f32.mxu0 %v1365_v0  ;;  %v1030_v4 = vpack.c.bf16 %v293_v2, %v291_v1  ;;  %v292_v5 = vld [vmem:[#allocation5 + $0x10] sm:$0xff]  ;;  %v295_v6 = vld [vmem:[#allocation5 + $0x28] sm:$0xff]  ;;  %s837_s15 = sshll.u32 %s1752_s10, 4  ;;  %s1788_s11 = scalar_lea.hbm %s1841_s5, %s949_s28  ;;  %s1790_s15 = int_to_ptr.vmem [resolvable:$true] %s837_s15 }
  0x6c   : > { %v297_v7 = vld [vmem:[#allocation5 + $0x38] sm:$0xff]  ;;  %v1032_v8 = vpack.c.bf16 %v292_v5, %v290_v3  ;;  %v294_v10 = vld [vmem:[#allocation5 + $0x20] sm:$0xff]  ;;  %v296_v11 = vld [vmem:[#allocation5 + $0x30] sm:$0xff]  ;;  %s824_s23 = scalar_lea.sflag [#allocation4], %s1577_s17  ;;  %s1286_s7 = scalar_lea.vmem %s1790_s15, 2048 }
  0x6d   : > { %v1034_v9 = vpack.c.bf16 %v297_v7, %v295_v6  ;;  %v299_v12 = vld [vmem:[#allocation5 + $0x48] sm:$0xff]  ;;  %1031 = vmatprep.subr.bf16.mxu0 %v1030_v4  ;;  %v301_v13 = vld [vmem:[#allocation5 + $0x58] sm:$0xff]  ;;  %v1036_v14 = vpack.c.bf16 %v296_v11, %v294_v10  ;;  %v298_v16 = vld [vmem:[#allocation5 + $0x40] sm:$0xff]  ;;  %p1287_p11 = scmp.ne.s32.totalorder %s1790_s15, %s1286_s7  ;;  %p1855_p0 = scmp.ne.s32.totalorder %s1850_s29, 0 }
  0x6e   : > { %1033 = vmatpush1.bf16.msra.mxu0 %v1032_v8  ;;  %v1038_v15 = vpack.c.bf16 %v301_v13, %v299_v12  ;;  %v300_v17 = vld [vmem:[#allocation5 + $0x50] sm:$0xff]  ;;  %v303_v18 = vld [vmem:[#allocation5 + $0x68] sm:$0xff]  ;;  %v305_v19 = vld [vmem:[#allocation5 + $0x78] sm:$0xff]  ;;  %s1366_s22 = smov [#allocation8]  }
  0x6f   : > { %1035 = vmatprep.subr.bf16.mxu0 %v1034_v9  ;;  %v1040_v20 = vpack.c.bf16 %v300_v17, %v298_v16  ;;  %v1042_v21 = vpack.c.bf16 %v305_v19, %v303_v18  ;;  %v302_v22 = vld [vmem:[#allocation5 + $0x60] sm:$0xff]  ;;  %v304_v23 = vld [vmem:[#allocation5 + $0x70] sm:$0xff]  ;;  %v307_v24 = vld [vmem:[#allocation5 + $0x88] sm:$0xff]  ;;  %p1288_p1 = pnand %p1287_p11, %p1855_p0  ;;  %s1290_s6 = sshll.u32 %s1366_s22, 4  ;;  %s1291_s6 = int_to_ptr.vmem [resolvable:$false] %s1290_s6 }
  0x70   : > { %v309_v25 = vld [vmem:[#allocation5 + $0x98] sm:$0xff]  ;;  %v1044_v26 = vpack.c.bf16 %v304_v23, %v302_v22  ;;  %v306_v28 = vld [vmem:[#allocation5 + $0x80] sm:$0xff]  ;;  %v308_v29 = vld [vmem:[#allocation5 + $0x90] sm:$0xff]  ;;  %s1292_s8 = scalar_lea.vmem %s1291_s6, 4096  ;;  %p1293_p5 = scmp.lt.s32.totalorder %s1790_s15, %s1291_s6 }
  0x71   : > { %v1046_v27 = vpack.c.bf16 %v309_v25, %v307_v24  ;;  %v311_v30 = vld [vmem:[#allocation5 + $0xa8] sm:$0xff]  ;;  %v313_v31 = vld [vmem:[#allocation5 + $0xb8] sm:$0xff]  ;;  %v310_v32 = vld [vmem:[#allocation5 + $0xa0] sm:$0xff]  ;;  %v1048_v34 = vpack.c.bf16 %v308_v29, %v306_v28  ;;  %p1289_p3 = pneg %p1288_p1  ;;  %p1294_p9 = scmp.lt.s32.totalorder %s1292_s8, %s1286_s7 }
  0x72   : > { %1037 = vmatpush1.bf16.msra.mxu0 %v1036_v14  ;;  %v312_v33 = vld [vmem:[#allocation5 + $0xb0] sm:$0xff]  ;;  %v315_v35 = vld [vmem:[#allocation5 + $0xc8] sm:$0xff]  ;;  %v317_v36 = vld [vmem:[#allocation5 + $0xd8] sm:$0xff]  ;;  %v1050_v40 = vpack.c.bf16 %v313_v31, %v311_v30 }
  0x73   : > { %1039 = vmatprep.subr.bf16.mxu0 %v1038_v15  ;;  %v543_v37 = vld [vmem:[#allocation7 + $0x80] sm:$0xff]  ;;  %v544_v38 = vld [vmem:[#allocation7 + $0x88] sm:$0xff]  ;;  %v545_v43 = vld [vmem:[#allocation7 + $0x90] sm:$0xff]  ;;  %v1052_v51 = vpack.c.bf16 %v312_v33, %v310_v32  ;;  %v1054_v55 = vpack.c.bf16 %v317_v36, %v315_v35  ;;  %p1295_p12 = por %p1294_p9, %p1293_p5 }
  0x74   : > { %v527_v39 = vld [vmem:[#allocation7] sm:$0xff]  ;;  %v1062_v41 = vpack.c.bf16 %v544_v38, %v543_v37  ;;  %v528_v42 = vld [vmem:[#allocation7 + $0x8] sm:$0xff]  ;;  %v546_v44 = vld [vmem:[#allocation7 + $0x98] sm:$0xff] }
  0x75   : > { %v1064_v45 = vpack.c.bf16 %v528_v42, %v527_v39  ;;  %v1066_v46 = vpack.c.bf16 %v546_v44, %v545_v43  ;;  %v529_v47 = vld [vmem:[#allocation7 + $0x10] sm:$0xff]  ;;  %v530_v48 = vld [vmem:[#allocation7 + $0x18] sm:$0xff]  ;;  %v547_v49 = vld [vmem:[#allocation7 + $0xa0] sm:$0xff]  ;;  %p1296_p2 = pnand %p1295_p12, %p1289_p3 }
  0x76   : > { %1041 = vmatpush1.bf16.msra.mxu0 %v1040_v20  ;;  %1063 = vmatprep.subr.bf16.mxu1 %v1062_v41  ;;  %v548_v50 = vld [vmem:[#allocation7 + $0xa8] sm:$0xff]  ;;  %v314_v52 = vld [vmem:[#allocation5 + $0xc0] sm:$0xff]  ;;  %v316_v53 = vld [vmem:[#allocation5 + $0xd0] sm:$0xff]  ;;  %v1068_v54 = vpack.c.bf16 %v530_v48, %v529_v47 }
  0x77   : > { %1043 = vmatprep.subr.bf16.mxu0 %v1042_v21  ;;  %1065 = vmatpush3.bf16.msra.mxu1 %v1064_v45  ;;  %v319_v56 = vld [vmem:[#allocation5 + $0xe8] sm:$0xff]  ;;  %v1070_v57 = vpack.c.bf16 %v548_v50, %v547_v49  ;;  %v531_v58 = vld [vmem:[#allocation7 + $0x20] sm:$0xff]  ;;  %v321_v60 = vld [vmem:[#allocation5 + $0xf8] sm:$0xff]  ;;  %v1056_v63 = vpack.c.bf16 %v316_v53, %v314_v52  ;;  %v324_v50 = vlaneseq }
  0x78   : > { %1067 = vmatprep.subr.bf16.mxu1 %v1066_v46  ;;  %v532_v59 = vld [vmem:[#allocation7 + $0x28] sm:$0xff]  ;;  %v549_v61 = vld [vmem:[#allocation7 + $0xb0] sm:$0xff]  ;;  %v550_v62 = vld [vmem:[#allocation7 + $0xb8] sm:$0xff]  ;;  %v1058_v3 = vpack.c.bf16 %v321_v60, %v319_v56 }
  0x79   : > { %v318_v1 = vld [vmem:[#allocation5 + $0xe0] sm:$0xff]  ;;  %v1072_v2 = vpack.c.bf16 %v532_v59, %v531_v58  ;;  %v320_v4 = vld [vmem:[#allocation5 + $0xf0] sm:$0xff]  ;;  %v1074_v5 = vpack.c.bf16 %v550_v62, %v549_v61  ;;  %v534_v7 = vld [vmem:[#allocation7 + $0x38] sm:$0xff] }
  0x7a   : > { %1045 = vmatpush1.bf16.msra.mxu0 %v1044_v26  ;;  %v533_v6 = vld [vmem:[#allocation7 + $0x30] sm:$0xff]  ;;  %v551_v8 = vld [vmem:[#allocation7 + $0xc0] sm:$0xff]  ;;  %v552_v9 = vld [vmem:[#allocation7 + $0xc8] sm:$0xff]  ;;  %v1060_v10 = vpack.c.bf16 %v320_v4, %v318_v1 }
  0x7b   : > { %1047 = vmatprep.subr.bf16.mxu0 %v1046_v27  ;;  %1069 = vmatpush3.bf16.msra.mxu1 %v1068_v54  ;;  %v1076_v11 = vpack.c.bf16 %v534_v7, %v533_v6  ;;  %v1078_v12 = vpack.c.bf16 %v552_v9, %v551_v8  ;;  %v535_v13 = vld [vmem:[#allocation7 + $0x40] sm:$0xff]  ;;  %v536_v14 = vld [vmem:[#allocation7 + $0x48] sm:$0xff]  ;;  %v553_v15 = vld [vmem:[#allocation7 + $0xd0] sm:$0xff] }
  0x7c   : > { %1071 = vmatprep.subr.bf16.mxu1 %v1070_v57  ;;  %v554_v16 = vld [vmem:[#allocation7 + $0xd8] sm:$0xff]  ;;  %v274_v17 = vld [vmem:[%s1583_s14] sm:$0xff]  ;;  %v1080_v18 = vpack.c.bf16 %v536_v14, %v535_v13  ;;  %v537_v20 = vld [vmem:[#allocation7 + $0x50] sm:$0xff] }
  0x7d   : > { %v1082_v19 = vpack.c.bf16 %v554_v16, %v553_v15  ;;  %v538_v21 = vld [vmem:[#allocation7 + $0x58] sm:$0xff]  ;;  %v555_v22 = vld [vmem:[#allocation7 + $0xe0] sm:$0xff]  ;;  %v556_v23 = vld [vmem:[#allocation7 + $0xe8] sm:$0xff] }
  0x7e   : > { %1049 = vmatpush1.bf16.msra.mxu0 %v1048_v34  ;;  %v275_v24 = vld [vmem:[%s1583_s14 + $0x8] sm:$0xff]  ;;  %v1084_v25 = vpack.c.bf16 %v538_v21, %v537_v20  ;;  %v1086_v26 = vpack.c.bf16 %v556_v23, %v555_v22  ;;  %v276_v27 = vld [vmem:[%s1583_s14 + $0x10] sm:$0xff]  ;;  %v277_v28 = vld [vmem:[%s1583_s14 + $0x18] sm:$0xff] }
  0x7f   : > { %1051 = vmatprep.subr.bf16.mxu0 %v1050_v40  ;;  %1073 = vmatpush3.bf16.msra.mxu1 %v1072_v2  ;;  %v278_v29 = vld [vmem:[%s1583_s14 + $0x20] sm:$0xff]  ;;  %v279_v30 = vld [vmem:[%s1583_s14 + $0x28] sm:$0xff]  ;;  %v280_v31 = vld [vmem:[%s1583_s14 + $0x30] sm:$0xff] }
  0x80   : > { %1075 = vmatprep.subr.bf16.mxu1 %v1074_v5  ;;  %v281_v32 = vld [vmem:[%s1583_s14 + $0x38] sm:$0xff]  ;;  %v282_v33 = vld [vmem:[%s1583_s14 + $0x40] sm:$0xff]  ;;  %v283_v34 = vld [vmem:[%s1583_s14 + $0x48] sm:$0xff] }
  0x81   : > { %v284_v35 = vld [vmem:[%s1583_s14 + $0x50] sm:$0xff]  ;;  %v285_v36 = vld [vmem:[%s1583_s14 + $0x58] sm:$0xff]  ;;  %v286_v37 = vld [vmem:[%s1583_s14 + $0x60] sm:$0xff] }
  0x82   : > { %1053 = vmatpush1.bf16.msra.mxu0 %v1052_v51  ;;  %v287_v38 = vld [vmem:[%s1583_s14 + $0x68] sm:$0xff]  ;;  %v288_v39 = vld [vmem:[%s1583_s14 + $0x70] sm:$0xff]  ;;  %v289_v40 = vld [vmem:[%s1583_s14 + $0x78] sm:$0xff]  ;;  %v325_v51 = vshrl.u32 %v324_v50, 7 }
  0x83   : > { %1055 = vmatprep.subr.bf16.mxu0 %v1054_v55  ;;  %1077 = vmatpush3.bf16.msra.mxu1 %v1076_v11  ;;  %v539_v41 = vld [vmem:[#allocation7 + $0x60] sm:$0xff]  ;;  %v540_v42 = vld [vmem:[#allocation7 + $0x68] sm:$0xff]  ;;  %v557_v44 = vld [vmem:[#allocation7 + $0xf0] sm:$0xff] }
  0x84   : > { %1079 = vmatprep.subr.bf16.mxu1 %v1078_v12  ;;  %v1088_v43 = vpack.c.bf16 %v540_v42, %v539_v41  ;;  %v558_v45 = vld [vmem:[#allocation7 + $0xf8] sm:$0xff]  ;;  %v541_v47 = vld [vmem:[#allocation7 + $0x70] sm:$0xff]  ;;  %v326_v52 = vsub.s32 0, %v325_v51  ;;  %v330_v53 = vsub.s32 1, %v325_v51 }
  0x85   : > { %v1090_v46 = vpack.c.bf16 %v558_v45, %v557_v44  ;;  %v542_v48 = vld [vmem:[#allocation7 + $0x78] sm:$0xff] }
  0x86   : > { %1057 = vmatpush1.bf16.msra.mxu0 %v1056_v63  ;;  %v1092_v49 = vpack.c.bf16 %v542_v48, %v541_v47 }
  0x87   : > { %1059 = vmatprep.subr.bf16.mxu0 %v1058_v3  ;;  %1081 = vmatpush3.bf16.msra.mxu1 %v1080_v18 }
  0x88   : > { %1083 = vmatprep.subr.bf16.mxu1 %v1082_v19 }
  0x8a   : > { %1061 = vmatpush1.bf16.msra.mxu0 %v1060_v10 }
  0x8b   : > { %1085 = vmatpush3.bf16.msra.mxu1 %v1084_v25 }
  0x8c   : > { %1087 = vmatprep.subr.bf16.mxu1 %v1086_v26 }
  0x8d   : > { %399 = vmatmul.mubr.f32.vlgmr.msra.gmra.mrb[0].mxu0 %v274_v17 }
  0x8e   : > { %404 = vmatprep.mubr.f32.mxu0 %v1365_v0 }
  0x8f   : > { %1089 = vmatpush3.bf16.msra.mxu1 %v1088_v43 }
  0x90   : > { %1091 = vmatprep.subr.bf16.mxu1 %v1090_v46 }
  0x91   : > { %405 = vmatmul.mubr.f32.gmra.mrb[2].mxu0 %v275_v24 }
  0x92   : > { %410 = vmatprep.mubr.f32.mxu0 %v1365_v0 }
  0x93   : > { %1093 = vmatpush3.bf16.msra.mxu1 %v1092_v49 }
  0x95   : > { %411 = vmatmul.mubr.f32.gmra.mrb[4].mxu0 %v276_v27 }
  0x96   : > { %416 = vmatprep.mubr.f32.mxu0 %v1365_v0 }
  0x99   : > { %417 = vmatmul.mubr.f32.gmra.mrb[6].mxu0 %v277_v28 }
  0x9a   : > { %422 = vmatprep.mubr.f32.mxu0 %v1365_v0 }
  0x9d   : > { %423 = vmatmul.mubr.f32.gmra.mrb[8].mxu0 %v278_v29 }
  0x9e   : > { %428 = vmatprep.mubr.f32.mxu0 %v1365_v0 }
  0xa1   : > { %429 = vmatmul.mubr.f32.gmra.mrb[10].mxu0 %v279_v30 }
  0xa2   : > { %434 = vmatprep.mubr.f32.mxu0 %v1365_v0 }
  0xa5   : > { %435 = vmatmul.mubr.f32.gmra.mrb[12].mxu0 %v280_v31 }
  0xa6   : > { %440 = vmatprep.mubr.f32.mxu0 %v1365_v0 }
  0xa9   : > { %441 = vmatmul.mubr.f32.gmra.mrb[14].mxu0 %v281_v32 }
  0xaa   : > { %446 = vmatprep.mubr.f32.mxu0 %v1365_v0 }
  0xad   : > { %447 = vmatmul.mubr.f32.gmra.mrb[16].mxu0 %v282_v33 }
  0xae   : > { %452 = vmatprep.mubr.f32.mxu0 %v1365_v0 }
  0xb1   : > { %453 = vmatmul.mubr.f32.gmra.mrb[18].mxu0 %v283_v34 }
  0xb2   : > { %458 = vmatprep.mubr.f32.mxu0 %v1365_v0 }
  0xb5   : > { %459 = vmatmul.mubr.f32.gmra.mrb[20].mxu0 %v284_v35 }
  0xb6   : > { %464 = vmatprep.mubr.f32.mxu0 %v1365_v0 }
  0xb9   : > { %465 = vmatmul.mubr.f32.gmra.mrb[22].mxu0 %v285_v36 }
  0xba   : > { %470 = vmatprep.mubr.f32.mxu0 %v1365_v0 }
  0xbd   : > { %471 = vmatmul.mubr.f32.gmra.mrb[24].mxu0 %v286_v37 }
  0xbe   : > { %476 = vmatprep.mubr.f32.mxu0 %v1365_v0 }
  0xc1   : > { %477 = vmatmul.mubr.f32.gmra.mrb[26].mxu0 %v287_v38 }
  0xc2   : > { %482 = vmatprep.mubr.f32.mxu0 %v1365_v0 }
  0xc5   : > { %483 = vmatmul.mubr.f32.gmra.mrb[28].mxu0 %v288_v39 }
  0xc6   : > { %488 = vmatprep.mubr.f32.mxu0 %v1365_v0  ;;  %v322_v0 = vld [vmem:[%s1838_s2] sm:$0x3] }
  0xc7   : > { %v1628_v54 = vrot.slane %v322_v0, %v326_v52  ;;  %v1630_v55 = vrot.slane %v322_v0, %v330_v53 }
  0xc9   : > { %489 = vmatmul.mubr.f32.gmra.mrb[30].mxu0 %v289_v40 }
 0x160   : > { %v400_v56 = vpop.f32.mrb[0].mxu0 }
 0x161   : > { %v401_v57 = vadd.f32 %v400_v56, %v1628_v54  ;;  %v402_v58 = vpop.f32.mrb[1].mxu0 }
 0x162   : > { %v403_v59 = vadd.f32 %v402_v58, %v1630_v55 }
 0x163   : > { %v495_v62 = vmax.f32 %v401_v57, 0.0 }
 0x164   : > { %v406_v60 = vpop.f32.mrb[2].mxu0  ;;  %v496_v61 = vmax.f32 %v403_v59, 0.0 }
 0x165   : > { %v407_v63 = vadd.f32 %v406_v60, %v1628_v54  ;;  %v408_v1 = vpop.f32.mrb[3].mxu0 }
 0x166   : > { %v409_v2 = vadd.f32 %v408_v1, %v1630_v55  ;;  %630 = vmatprep.mubr.f32.mxu1 %v496_v61 }
 0x167   : > { %631 = vmatmul.mubr.f32.vlgmr.msra.gmra.mrb[0].mxu1 %v495_v62  ;;  %v497_v5 = vmax.f32 %v407_v63, 0.0 }
 0x168   : > { %v498_v3 = vmax.f32 %v409_v2, 0.0  ;;  %v412_v4 = vpop.f32.mrb[4].mxu0 }
 0x169   : > { %v413_v6 = vadd.f32 %v412_v4, %v1628_v54  ;;  %v414_v7 = vpop.f32.mrb[5].mxu0 }
 0x16a   : > { %v415_v8 = vadd.f32 %v414_v7, %v1630_v55  ;;  %635 = vmatprep.mubr.f32.mxu1 %v498_v3 }
 0x16b   : > { %636 = vmatmul.mubr.f32.gmra.mrb[2].mxu1 %v497_v5  ;;  %v499_v11 = vmax.f32 %v413_v6, 0.0 }
 0x16c   : > { %v500_v9 = vmax.f32 %v415_v8, 0.0  ;;  %v418_v10 = vpop.f32.mrb[6].mxu0 }
 0x16d   : > { %v419_v12 = vadd.f32 %v418_v10, %v1628_v54  ;;  %v420_v13 = vpop.f32.mrb[7].mxu0 }
 0x16e   : > { %v421_v14 = vadd.f32 %v420_v13, %v1630_v55  ;;  %640 = vmatprep.mubr.f32.mxu1 %v500_v9 }
 0x16f   : > { %641 = vmatmul.mubr.f32.gmra.mrb[4].mxu1 %v499_v11  ;;  %v501_v17 = vmax.f32 %v419_v12, 0.0 }
 0x170   : > { %v502_v15 = vmax.f32 %v421_v14, 0.0  ;;  %v424_v16 = vpop.f32.mrb[8].mxu0 }
 0x171   : > { %v425_v18 = vadd.f32 %v424_v16, %v1628_v54  ;;  %v426_v19 = vpop.f32.mrb[9].mxu0 }
 0x172   : > { %v427_v20 = vadd.f32 %v426_v19, %v1630_v55  ;;  %645 = vmatprep.mubr.f32.mxu1 %v502_v15 }
 0x173   : > { %646 = vmatmul.mubr.f32.gmra.mrb[6].mxu1 %v501_v17  ;;  %v503_v23 = vmax.f32 %v425_v18, 0.0 }
 0x174   : > { %v504_v21 = vmax.f32 %v427_v20, 0.0  ;;  %v430_v22 = vpop.f32.mrb[10].mxu0 }
 0x175   : > { %v431_v24 = vadd.f32 %v430_v22, %v1628_v54  ;;  %v432_v25 = vpop.f32.mrb[11].mxu0 }
 0x176   : > { %v433_v26 = vadd.f32 %v432_v25, %v1630_v55  ;;  %650 = vmatprep.mubr.f32.mxu1 %v504_v21 }
 0x177   : > { %651 = vmatmul.mubr.f32.gmra.mrb[8].mxu1 %v503_v23  ;;  %v505_v29 = vmax.f32 %v431_v24, 0.0 }
 0x178   : > { %v506_v27 = vmax.f32 %v433_v26, 0.0  ;;  %v436_v28 = vpop.f32.mrb[12].mxu0 }
 0x179   : > { %v437_v30 = vadd.f32 %v436_v28, %v1628_v54  ;;  %v438_v31 = vpop.f32.mrb[13].mxu0 }
 0x17a   : > { %v439_v32 = vadd.f32 %v438_v31, %v1630_v55  ;;  %655 = vmatprep.mubr.f32.mxu1 %v506_v27 }
 0x17b   : > { %656 = vmatmul.mubr.f32.gmra.mrb[10].mxu1 %v505_v29  ;;  %v507_v35 = vmax.f32 %v437_v30, 0.0  ;;  %v1667_v29 = vld [vmem:[%s1840_s4] ss:$0 sm:$0xff] }
 0x17c   : > { %v508_v33 = vmax.f32 %v439_v32, 0.0  ;;  %v442_v34 = vpop.f32.mrb[14].mxu0 }
 0x17d   : > { %v443_v36 = vadd.f32 %v442_v34, %v1628_v54  ;;  %v444_v37 = vpop.f32.mrb[15].mxu0 }
 0x17e   : > { %v445_v38 = vadd.f32 %v444_v37, %v1630_v55  ;;  %660 = vmatprep.mubr.f32.mxu1 %v508_v33 }
 0x17f   : > { %661 = vmatmul.mubr.f32.gmra.mrb[12].mxu1 %v507_v35  ;;  %v509_v41 = vmax.f32 %v443_v36, 0.0 }
 0x180   : > { %v510_v39 = vmax.f32 %v445_v38, 0.0  ;;  %v448_v40 = vpop.f32.mrb[16].mxu0 }
 0x181   : > { %v449_v42 = vadd.f32 %v448_v40, %v1628_v54  ;;  %v450_v43 = vpop.f32.mrb[17].mxu0 }
 0x182   : > { %v451_v44 = vadd.f32 %v450_v43, %v1630_v55  ;;  %665 = vmatprep.mubr.f32.mxu1 %v510_v39 }
 0x183   : > { %666 = vmatmul.mubr.f32.gmra.mrb[14].mxu1 %v509_v41  ;;  %v511_v47 = vmax.f32 %v449_v42, 0.0 }
 0x184   : > { %v512_v45 = vmax.f32 %v451_v44, 0.0  ;;  %v454_v46 = vpop.f32.mrb[18].mxu0 }
 0x185   : > { %v455_v48 = vadd.f32 %v454_v46, %v1628_v54  ;;  %v456_v49 = vpop.f32.mrb[19].mxu0 }
 0x186   : > { %v457_v50 = vadd.f32 %v456_v49, %v1630_v55  ;;  %670 = vmatprep.mubr.f32.mxu1 %v512_v45 }
 0x187   : > { %671 = vmatmul.mubr.f32.gmra.mrb[16].mxu1 %v511_v47  ;;  %v513_v0 = vmax.f32 %v455_v48, 0.0 }
 0x188   : > { %v514_v51 = vmax.f32 %v457_v50, 0.0  ;;  %v460_v52 = vpop.f32.mrb[20].mxu0 }
 0x189   : > { %v461_v53 = vadd.f32 %v460_v52, %v1628_v54  ;;  %v462_v56 = vpop.f32.mrb[21].mxu0 }
 0x18a   : > { %v463_v57 = vadd.f32 %v462_v56, %v1630_v55  ;;  %675 = vmatprep.mubr.f32.mxu1 %v514_v51 }
 0x18b   : > { %676 = vmatmul.mubr.f32.gmra.mrb[18].mxu1 %v513_v0  ;;  %v515_v60 = vmax.f32 %v461_v53, 0.0 }
 0x18c   : > { %v516_v58 = vmax.f32 %v463_v57, 0.0  ;;  %v466_v59 = vpop.f32.mrb[22].mxu0 }
 0x18d   : > { %v467_v61 = vadd.f32 %v466_v59, %v1628_v54  ;;  %v468_v62 = vpop.f32.mrb[23].mxu0 }
 0x18e   : > { %v469_v63 = vadd.f32 %v468_v62, %v1630_v55  ;;  %680 = vmatprep.mubr.f32.mxu1 %v516_v58 }
 0x18f   : > { %681 = vmatmul.mubr.f32.gmra.mrb[20].mxu1 %v515_v60  ;;  %v517_v3 = vmax.f32 %v467_v61, 0.0 }
 0x190   : > { %v518_v1 = vmax.f32 %v469_v63, 0.0  ;;  %v472_v2 = vpop.f32.mrb[24].mxu0 }
 0x191   : > { %v473_v4 = vadd.f32 %v472_v2, %v1628_v54  ;;  %v474_v5 = vpop.f32.mrb[25].mxu0 }
 0x192   : > { %v475_v6 = vadd.f32 %v474_v5, %v1630_v55  ;;  %685 = vmatprep.mubr.f32.mxu1 %v518_v1 }
 0x193   : > { %686 = vmatmul.mubr.f32.gmra.mrb[22].mxu1 %v517_v3  ;;  %v519_v9 = vmax.f32 %v473_v4, 0.0 }
 0x194   : > { %v520_v7 = vmax.f32 %v475_v6, 0.0  ;;  %v478_v8 = vpop.f32.mrb[26].mxu0 }
 0x195   : > { %v479_v10 = vadd.f32 %v478_v8, %v1628_v54  ;;  %v480_v11 = vpop.f32.mrb[27].mxu0 }
 0x196   : > { %v481_v12 = vadd.f32 %v480_v11, %v1630_v55  ;;  %690 = vmatprep.mubr.f32.mxu1 %v520_v7 }
 0x197   : > { %691 = vmatmul.mubr.f32.gmra.mrb[24].mxu1 %v519_v9  ;;  %v521_v15 = vmax.f32 %v479_v10, 0.0 }
 0x198   : > { %v522_v13 = vmax.f32 %v481_v12, 0.0  ;;  %v484_v14 = vpop.f32.mrb[28].mxu0 }
 0x199   : > { %v485_v16 = vadd.f32 %v484_v14, %v1628_v54  ;;  %v486_v17 = vpop.f32.mrb[29].mxu0 }
 0x19a   : > { %v487_v18 = vadd.f32 %v486_v17, %v1630_v55  ;;  %695 = vmatprep.mubr.f32.mxu1 %v522_v13 }
 0x19b   : > { %696 = vmatmul.mubr.f32.gmra.mrb[26].mxu1 %v521_v15  ;;  %v523_v21 = vmax.f32 %v485_v16, 0.0 }
 0x19c   : > { %v524_v19 = vmax.f32 %v487_v18, 0.0  ;;  %v490_v20 = vpop.f32.mrb[30].mxu0 }
 0x19d   : > { %v491_v22 = vadd.f32 %v490_v20, %v1628_v54  ;;  %v492_v23 = vpop.f32.mrb[31].mxu0 }
 0x19e   : > { %v493_v24 = vadd.f32 %v492_v23, %v1630_v55  ;;  %700 = vmatprep.mubr.f32.mxu1 %v524_v19 }
 0x19f   : > { %701 = vmatmul.mubr.f32.gmra.mrb[28].mxu1 %v523_v21  ;;  %v525_v26 = vmax.f32 %v491_v22, 0.0 }
 0x1a0   : > { %v526_v25 = vmax.f32 %v493_v24, 0.0 }
 0x1a2   : > { %705 = vmatprep.mubr.f32.mxu1 %v526_v25 }
 0x1a3   : > { %706 = vmatmul.mubr.f32.gmra.mrb[30].mxu1 %v525_v26 }
 0x23a   : > { %v982_v27 = vpop.f32.mrb[0].mxu1 }
 0x23b   : > { %v983_v28 = vpop.f32.mrb[1].mxu1 }
 0x23c   : > { %v984_v30 = vadd.f32 %v983_v28, %v982_v27 }
 0x23e   : > { %v985_v31 = vpop.f32.mrb[2].mxu1  ;;  %v1670_v54 = vadd.f32 %v984_v30, %v1667_v29 }
 0x23f   : > { %v986_v32 = vpop.f32.mrb[3].mxu1 }
 0x240   : > { %v987_v55 = vadd.f32 %v986_v32, %v985_v31  ;;  %v711_v33 = vmul.f32 %v1670_v54, %v1670_v54 }
 0x242   : > { %v1675_v34 = vadd.f32 %v987_v55, %v1667_v29  ;;  %v988_v35 = vpop.f32.mrb[4].mxu1  ;;  %727 = vadd.xlane.f32.xlu0 %v711_v33 }
 0x243   : > { %v989_v36 = vpop.f32.mrb[5].mxu1 }
 0x244   : > { %v990_v37 = vadd.f32 %v989_v36, %v988_v35  ;;  %v712_v38 = vmul.f32 %v1675_v34, %v1675_v34 }
 0x246   : > { %v991_v39 = vpop.f32.mrb[6].mxu1  ;;  %729 = vadd.xlane.f32.xlu0 %v712_v38  ;;  %v1680_v40 = vadd.f32 %v990_v37, %v1667_v29 }
 0x247   : > { %v992_v41 = vpop.f32.mrb[7].mxu1 }
 0x248   : > { %v993_v42 = vadd.f32 %v992_v41, %v991_v39  ;;  %v713_v43 = vmul.f32 %v1680_v40, %v1680_v40 }
 0x24a   : > { %v1685_v44 = vadd.f32 %v993_v42, %v1667_v29  ;;  %v994_v45 = vpop.f32.mrb[8].mxu1  ;;  %731 = vadd.xlane.f32.xlu1 %v713_v43 }
 0x24b   : > { %v995_v46 = vpop.f32.mrb[9].mxu1 }
 0x24c   : > { %v996_v47 = vadd.f32 %v995_v46, %v994_v45  ;;  %v714_v48 = vmul.f32 %v1685_v44, %v1685_v44 }
 0x24e   : > { %v1690_v49 = vadd.f32 %v996_v47, %v1667_v29  ;;  %v997_v50 = vpop.f32.mrb[10].mxu1  ;;  %733 = vadd.xlane.f32.xlu1 %v714_v48 }
 0x24f   : > { %v998_v51 = vpop.f32.mrb[11].mxu1 }
 0x250   : > { %v999_v52 = vadd.f32 %v998_v51, %v997_v50  ;;  %v715_v0 = vmul.f32 %v1690_v49, %v1690_v49 }
 0x252   : > { %v1695_v53 = vadd.f32 %v999_v52, %v1667_v29  ;;  %v1000_v56 = vpop.f32.mrb[12].mxu1  ;;  %735 = vadd.xlane.f32.xlu0 %v715_v0 }
 0x253   : > { %v1001_v57 = vpop.f32.mrb[13].mxu1 }
 0x254   : > { %v1002_v58 = vadd.f32 %v1001_v57, %v1000_v56  ;;  %v716_v59 = vmul.f32 %v1695_v53, %v1695_v53 }
 0x256   : > { %v1700_v60 = vadd.f32 %v1002_v58, %v1667_v29  ;;  %v1003_v61 = vpop.f32.mrb[14].mxu1  ;;  %737 = vadd.xlane.f32.xlu1 %v716_v59 }
 0x257   : > { %v1004_v62 = vpop.f32.mrb[15].mxu1 }
 0x258   : > { %v1005_v63 = vadd.f32 %v1004_v62, %v1003_v61  ;;  %v717_v1 = vmul.f32 %v1700_v60, %v1700_v60 }
 0x25a   : > { %v1705_v2 = vadd.f32 %v1005_v63, %v1667_v29  ;;  %v1006_v3 = vpop.f32.mrb[16].mxu1  ;;  %739 = vadd.xlane.f32.xlu0 %v717_v1 }
 0x25b   : > { %v1007_v4 = vpop.f32.mrb[17].mxu1 }
 0x25c   : > { %v1008_v5 = vadd.f32 %v1007_v4, %v1006_v3  ;;  %v718_v6 = vmul.f32 %v1705_v2, %v1705_v2 }
 0x25e   : > { %v1710_v7 = vadd.f32 %v1008_v5, %v1667_v29  ;;  %v1009_v8 = vpop.f32.mrb[18].mxu1  ;;  %741 = vadd.xlane.f32.xlu1 %v718_v6 }
 0x25f   : > { %v1010_v9 = vpop.f32.mrb[19].mxu1 }
 0x260   : > { %v1011_v10 = vadd.f32 %v1010_v9, %v1009_v8  ;;  %v719_v11 = vmul.f32 %v1710_v7, %v1710_v7 }
 0x262   : > { %v1715_v12 = vadd.f32 %v1011_v10, %v1667_v29  ;;  %v1012_v13 = vpop.f32.mrb[20].mxu1  ;;  %743 = vadd.xlane.f32.xlu0 %v719_v11 }
 0x263   : > { %v1013_v14 = vpop.f32.mrb[21].mxu1 }
 0x264   : > { %v1014_v15 = vadd.f32 %v1013_v14, %v1012_v13  ;;  %v720_v16 = vmul.f32 %v1715_v12, %v1715_v12 }
 0x266   : > { %v1720_v17 = vadd.f32 %v1014_v15, %v1667_v29  ;;  %v1015_v18 = vpop.f32.mrb[22].mxu1  ;;  %745 = vadd.xlane.f32.xlu1 %v720_v16 }
 0x267   : > { %v1016_v19 = vpop.f32.mrb[23].mxu1 }
 0x268   : > { %v1017_v20 = vadd.f32 %v1016_v19, %v1015_v18  ;;  %v721_v21 = vmul.f32 %v1720_v17, %v1720_v17 }
 0x26a   : > { %v1725_v22 = vadd.f32 %v1017_v20, %v1667_v29  ;;  %v1018_v23 = vpop.f32.mrb[24].mxu1  ;;  %747 = vadd.xlane.f32.xlu0 %v721_v21 }
 0x26b   : > { %v1019_v24 = vpop.f32.mrb[25].mxu1 }
 0x26c   : > { %v1020_v25 = vadd.f32 %v1019_v24, %v1018_v23  ;;  %v722_v26 = vmul.f32 %v1725_v22, %v1725_v22 }
 0x26e   : > { %v1730_v27 = vadd.f32 %v1020_v25, %v1667_v29  ;;  %v1021_v28 = vpop.f32.mrb[26].mxu1  ;;  %749 = vadd.xlane.f32.xlu1 %v722_v26 }
 0x26f   : > { %v1022_v30 = vpop.f32.mrb[27].mxu1 }
 0x270   : > { %v1023_v31 = vadd.f32 %v1022_v30, %v1021_v28  ;;  %v723_v32 = vmul.f32 %v1730_v27, %v1730_v27 }
 0x272   : > { %v1735_v55 = vadd.f32 %v1023_v31, %v1667_v29  ;;  %v1024_v33 = vpop.f32.mrb[28].mxu1  ;;  %751 = vadd.xlane.f32.xlu0 %v723_v32 }
 0x273   : > { %v1025_v35 = vpop.f32.mrb[29].mxu1 }
 0x274   : > { %v1026_v36 = vadd.f32 %v1025_v35, %v1024_v33  ;;  %v724_v37 = vmul.f32 %v1735_v55, %v1735_v55 }
 0x276   : > { %v1740_v38 = vadd.f32 %v1026_v36, %v1667_v29  ;;  %v1027_v39 = vpop.f32.mrb[30].mxu1  ;;  %753 = vadd.xlane.f32.xlu1 %v724_v37 }
 0x277   : > { %v1028_v41 = vpop.f32.mrb[31].mxu1 }
 0x278   : > { %v1029_v42 = vadd.f32 %v1028_v41, %v1027_v39  ;;  %v725_v43 = vmul.f32 %v1740_v38, %v1740_v38 }
 0x27a   : > { %v1745_v45 = vadd.f32 %v1029_v42, %v1667_v29  ;;  %755 = vadd.xlane.f32.xlu0 %v725_v43 }
 0x27c   : > { %v726_v46 = vmul.f32 %v1745_v45, %v1745_v45 }
 0x27e   : > { %757 = vadd.xlane.f32.xlu1 %v726_v46 }
 0x2cf   : > { %v728_v47 = vpop.xlane.xlu0 %727 }
 0x2d0   : > { %v759_v48 = vmax.f32 %v728_v47, 1e-24 }
 0x2d2   : > { %1168 = vrsqrt.f32 %v759_v48 }
 0x2d3   : > { %v730_v50 = vpop.xlane.xlu0 %729 }
 0x2d4   : > { %v760_v51 = vmax.f32 %v730_v50, 1e-24 }
 0x2d6   : > { %1170 = vrsqrt.f32 %v760_v51 }
 0x2d7   : > { %v732_v52 = vpop.xlane.xlu1 %731 }
 0x2d8   : > { %v761_v0 = vmax.f32 %v732_v52, 1e-24 }
 0x2da   : > { %1172 = vrsqrt.f32 %v761_v0 }
 0x2db   : > { %v734_v56 = vpop.xlane.xlu1 %733 }
 0x2dc   : > { %v1169_v57 = vpop.eup %1168  ;;  %v762_v58 = vmax.f32 %v734_v56, 1e-24 }
 0x2dd   : > { %v791_v29 = vmul.f32 %v1169_v57, %v1670_v54 }
 0x2de   : > { %1174 = vrsqrt.f32 %v762_v58 }
 0x2df   : > { %807 = vst [vmem:[%s1752_s10] sm:$0xff] %v791_v29  ;;  %v736_v59 = vpop.xlane.xlu0 %735 }
 0x2e0   : > { %v1171_v61 = vpop.eup %1170  ;;  %v763_v62 = vmax.f32 %v736_v59, 1e-24 }
 0x2e1   : > { %v792_v63 = vmul.f32 %v1171_v61, %v1675_v34 }
 0x2e2   : > { %1176 = vrsqrt.f32 %v763_v62 }
 0x2e3   : > { %808 = vst [vmem:[%s1752_s10 + $0x8] sm:$0xff] %v792_v63  ;;  %v738_v1 = vpop.xlane.xlu1 %737 }
 0x2e4   : > { %v1173_v3 = vpop.eup %1172  ;;  %v764_v54 = vmax.f32 %v738_v1, 1e-24 }
 0x2e5   : > { %v793_v4 = vmul.f32 %v1173_v3, %v1680_v40 }
 0x2e6   : > { %1178 = vrsqrt.f32 %v764_v54 }
 0x2e7   : > { %809 = vst [vmem:[%s1752_s10 + $0x10] sm:$0xff] %v793_v4  ;;  %v740_v5 = vpop.xlane.xlu0 %739 }
 0x2e8   : > { %v1175_v6 = vpop.eup %1174  ;;  %v765_v8 = vmax.f32 %v740_v5, 1e-24 }
 0x2e9   : > { %v794_v9 = vmul.f32 %v1175_v6, %v1685_v44 }
 0x2ea   : > { %1180 = vrsqrt.f32 %v765_v8 }
 0x2eb   : > { %810 = vst [vmem:[%s1752_s10 + $0x18] sm:$0xff] %v794_v9  ;;  %v742_v10 = vpop.xlane.xlu1 %741 }
 0x2ec   : > { %v1177_v34 = vpop.eup %1176  ;;  %v766_v11 = vmax.f32 %v742_v10, 1e-24 }
 0x2ed   : > { %v795_v13 = vmul.f32 %v1177_v34, %v1690_v49 }
 0x2ee   : > { %1182 = vrsqrt.f32 %v766_v11 }
 0x2ef   : > { %811 = vst [vmem:[%s1752_s10 + $0x20] sm:$0xff] %v795_v13  ;;  %v744_v14 = vpop.xlane.xlu0 %743 }
 0x2f0   : > { %v1179_v40 = vpop.eup %1178  ;;  %v767_v15 = vmax.f32 %v744_v14, 1e-24 }
 0x2f1   : > { %v796_v16 = vmul.f32 %v1179_v40, %v1695_v53 }
 0x2f2   : > { %1184 = vrsqrt.f32 %v767_v15 }
 0x2f3   : > { %812 = vst [vmem:[%s1752_s10 + $0x28] sm:$0xff] %v796_v16  ;;  %v746_v18 = vpop.xlane.xlu1 %745 }
 0x2f4   : > { %v1181_v44 = vpop.eup %1180  ;;  %v768_v19 = vmax.f32 %v746_v18, 1e-24 }
 0x2f5   : > { %v797_v20 = vmul.f32 %v1181_v44, %v1700_v60 }
 0x2f6   : > { %1186 = vrsqrt.f32 %v768_v19 }
 0x2f7   : > { %813 = vst [vmem:[%s1752_s10 + $0x30] sm:$0xff] %v797_v20  ;;  %v748_v21 = vpop.xlane.xlu0 %747 }
 0x2f8   : > { %v1183_v49 = vpop.eup %1182  ;;  %v769_v23 = vmax.f32 %v748_v21, 1e-24 }
 0x2f9   : > { %v798_v24 = vmul.f32 %v1183_v49, %v1705_v2 }
 0x2fa   : > { %1188 = vrsqrt.f32 %v769_v23 }
 0x2fb   : > { %814 = vst [vmem:[%s1752_s10 + $0x38] sm:$0xff] %v798_v24  ;;  %v750_v25 = vpop.xlane.xlu1 %749 }
 0x2fc   : > { %v1185_v53 = vpop.eup %1184  ;;  %v770_v26 = vmax.f32 %v750_v25, 1e-24 }
 0x2fd   : > { %v799_v28 = vmul.f32 %v1185_v53, %v1710_v7 }
 0x2fe   : > { %1190 = vrsqrt.f32 %v770_v26 }
 0x2ff   : > { %815 = vst [vmem:[%s1752_s10 + $0x40] sm:$0xff] %v799_v28  ;;  %v752_v30 = vpop.xlane.xlu0 %751 }
 0x300   : > { %v1187_v60 = vpop.eup %1186  ;;  %v771_v31 = vmax.f32 %v752_v30, 1e-24 }
 0x301   : > { %v800_v32 = vmul.f32 %v1187_v60, %v1715_v12 }
 0x302   : > { %1192 = vrsqrt.f32 %v771_v31 }
 0x303   : > { %816 = vst [vmem:[%s1752_s10 + $0x48] sm:$0xff] %v800_v32  ;;  %v754_v33 = vpop.xlane.xlu1 %753 }
 0x304   : > { %v1189_v2 = vpop.eup %1188  ;;  %v772_v35 = vmax.f32 %v754_v33, 1e-24 }
 0x305   : > { %v801_v36 = vmul.f32 %v1189_v2, %v1720_v17 }
 0x306   : > { %1194 = vrsqrt.f32 %v772_v35 }
 0x307   : > { %817 = vst [vmem:[%s1752_s10 + $0x50] sm:$0xff] %v801_v36  ;;  %v756_v7 = vpop.xlane.xlu0 %755 }
 0x308   : > { %v1191_v37 = vpop.eup %1190  ;;  %v773_v39 = vmax.f32 %v756_v7, 1e-24 }
 0x309   : > { %v802_v41 = vmul.f32 %v1191_v37, %v1725_v22 }
 0x30a   : > { %1196 = vrsqrt.f32 %v773_v39 }
 0x30b   : > { %818 = vst [vmem:[%s1752_s10 + $0x58] sm:$0xff] %v802_v41  ;;  %v758_v12 = vpop.xlane.xlu1 %757 }
 0x30c   : > { %v1193_v42 = vpop.eup %1192  ;;  %v774_v43 = vmax.f32 %v758_v12, 1e-24 }
 0x30d   : > { %v803_v46 = vmul.f32 %v1193_v42, %v1730_v27 }
 0x30e   : > { %1198 = vrsqrt.f32 %v774_v43 }
 0x30f   : > { %819 = vst [vmem:[%s1752_s10 + $0x60] sm:$0xff] %v803_v46 }
 0x310   : > { %v1195_v17 = vpop.eup %1194 }
 0x311   : > { %v804_v47 = vmul.f32 %v1195_v17, %v1735_v55 }
 0x313   : > { %820 = vst [vmem:[%s1752_s10 + $0x68] sm:$0xff] %v804_v47 }
 0x314   : > { %v1197_v48 = vpop.eup %1196 }
 0x315   : > { %v805_v22 = vmul.f32 %v1197_v48, %v1740_v38 }
 0x317   : > { %821 = vst [vmem:[%s1752_s10 + $0x70] sm:$0xff] %v805_v22 }
 0x318   : > { %v1199_v50 = vpop.eup %1198 }
 0x319   : > { %v806_v27 = vmul.f32 %v1199_v50, %v1745_v45 }
 0x31b   : > { %822 = vst [vmem:[%s1752_s10 + $0x78] sm:$0xff] %v806_v27 }
 0x31c   : > { %1299 = shalt.err (!%p1296_p2)
}
 0x31d   : > { %s1300_s14 = scalar_lea.hbm %s1788_s11, 2048  ;;  %s1304_s12 = scalar_lea.hbm %s1841_s5, 4096 }
 0x31e   : > { %p1301_p13 = scmp.ne.s32.totalorder %s1788_s11, %s1300_s14  ;;  %p1305_p4 = scmp.lt.u32.totalorder %s1788_s11, %s1841_s5 }
 0x31f   : > { %p1306_p7 = scmp.lt.u32.totalorder %s1304_s12, %s1300_s14  ;;  %p1308_p11 = scmp.lt.u32.totalorder %s1300_s14, %s1788_s11 }
 0x320   : > { %p1302_p6 = pnand %p1301_p13, %p1855_p0 }
 0x321   : > { %p1307_p8 = por %p1306_p7, %p1305_p4 }
 0x322   : > { %p1303_p10 = pneg %p1302_p6 }
 0x323   : > { %p1309_p1 = por %p1308_p11, %p1307_p8 }
 0x325   : > { %p1310_p3 = pnand %p1309_p1, %p1303_p10 }
 0x327   : > { %1313 = shalt.err (!%p1310_p3)
}
 0x328   : > { %s1367_s28 = smov 128   ;;  %s1368_s9 = smov 8  }
 0x329   : > { %1104 = dma.vmem_to_hbm [thread:$0]  (%p1855_p0), %s1790_s15, 2048, %s1788_s11, %s824_s23, %s1367_s28, %s1367_s28, %s1368_s9  }
 0x32a PF: > { %s852_s30 = sand.u32 1, %s1344_s18   ;;  %p1856_p5 = scmp.ne.s32.totalorder %s1846_s25, 0 }
 0x32b   : > { %p1857_p9 = scmp.ge.s32.totalorder %s1356_s21, 2  ;;  %s853_s7 = scalar_lea.sflag [#allocation4], %s852_s30 }
 0x32d   : > { %p1118_p12 = pnand %p1857_p9, %p1856_p5 }
 0x32f   : > { %1339 = dma.done.wait (!%p1118_p12), %s853_s7, 2048  }
 0x330   : > { %1341 = vsyncadd (!%p1118_p12), %s853_s7, 4294965248  ;;  %p19_p2 = scmp.ge.s32.totalorder %s1512_s16, 4   ;;  %s1858_s18 = smov %s1348_s19 }
 0x331   : > { %s1859_s19 = smov %s1352_s20  ;;  %s1860_s20 = smov %s1521_s27 }
 0x332   : > { %s1861_s21 = smov %s1512_s16  ;;  %21 = sbr.rel (!%p19_p2) target bundleno = 6 (0x6), region = 93 }
 0x339   :  { %858 = vsyncpa [#allocation3], 1 }
 0x33a   :  { %860 = vsyncpa [#allocation3 + $0x1], 1 }
 0x33b   :  { %861 = vsyncpa [#allocation6], 1 }
 0x33c   :  { %862 = vsyncpa [#allocation4], 1 }
 0x33d   :  { %864 = vsyncpa [#allocation4 + $0x1], 1 }

</bundles_post_ra>
